<compile_context>
chip_gen: v7x
topology: tpu7x:2x2x1
jax: 0.10.0
libtpu: 0.0.40
codegen_flags: <defaults>
</compile_context>

<pallas_src>
import jax
import jax.numpy as jnp
from jax.experimental import pallas as pl
from jax.experimental.pallas import tpu as pltpu


# -----------------------------------------------------------------------------
# Tiled linear: y = x @ w + b   (w bf16, b f32, f32 accumulation)
# -----------------------------------------------------------------------------
def _linear_kernel(x_ref, w_ref, b_ref, o_ref):
    o_ref[...] = (
        jnp.dot(
            x_ref[...].astype(jnp.bfloat16),
            w_ref[...],
            preferred_element_type=jnp.float32,
        )
        + b_ref[...]
    ).astype(o_ref.dtype)


def linear(x, w, b, *, tm=256, tn=512):
    """Row/col tiled matmul + bias.  Contraction dim K stays fully resident per
    tile (keep K*tn*2 bytes well under the per-generation VMEM budget; tn<=512
    is safe even for the v7x 64 MiB VMEM).
    """
    # TODO(synk): add a K grid axis + f32 VMEM accumulator for hidden dims that
    # do not fit VMEM; not needed at these model sizes.
    M, K = x.shape
    N = w.shape[1]
    tm = min(tm, M)
    tn = min(tn, N)
    grid = (pl.cdiv(M, tm), pl.cdiv(N, tn))
    return pl.pallas_call(
        _linear_kernel,
        out_shape=jax.ShapeDtypeStruct((M, N), jnp.float32),
        grid_spec=pltpu.PrefetchScalarGridSpec(
            num_scalar_prefetch=0,
            grid=grid,
            in_specs=[
                pl.BlockSpec((tm, K), lambda i, j: (i, 0)),
                pl.BlockSpec((K, tn), lambda i, j: (0, j)),
                pl.BlockSpec((1, tn), lambda i, j: (0, j)),
            ],
            out_specs=pl.BlockSpec((tm, tn), lambda i, j: (i, j)),
        ),
        compiler_params=pltpu.CompilerParams(
            dimension_semantics=("parallel", "parallel")
        ),
    )(x, w, b)


# -----------------------------------------------------------------------------
# GRU recurrence with precomputed input gates gi = x @ Wi + bi  (T, B, 3H)
# -----------------------------------------------------------------------------
def _gru_cell(gi, h, wh_ref, bh_ref):
    """One GRU step.  gi: (B, 3H) f32 (input gates, bias folded in),
    h: (B, H) f32 state, wh_ref: (H, 3H) bf16, bh_ref: (1, 3H) f32."""
    H = h.shape[1]
    gh = (
        jnp.dot(h.astype(jnp.bfloat16), wh_ref[...],
                preferred_element_type=jnp.float32)
        + bh_ref[...]
    )
    # PyTorch GRU gate ordering: reset (r), update (z), new (n)
    r = jax.nn.sigmoid(gi[:, :H] + gh[:, :H])
    z = jax.nn.sigmoid(gi[:, H:2 * H] + gh[:, H:2 * H])
    n = jnp.tanh(gi[:, 2 * H:] + r * gh[:, 2 * H:])
    return (1.0 - z) * n + z * h


def _gru_all_kernel(gi_ref, wh_ref, bh_ref, h0_ref, hs_ref, h_state):
    t = pl.program_id(0)

    @pl.when(t == 0)
    def _():
        h_state[...] = h0_ref[...]

    h_new = _gru_cell(gi_ref[0], h_state[...], wh_ref, bh_ref)
    h_state[...] = h_new
    hs_ref[0] = h_new


def _gru_last_kernel(gi_ref, wh_ref, bh_ref, h0_ref, hl_ref, h_state):
    t = pl.program_id(0)

    @pl.when(t == 0)
    def _():
        h_state[...] = h0_ref[...]

    h_new = _gru_cell(gi_ref[0], h_state[...], wh_ref, bh_ref)
    h_state[...] = h_new

    # Output block is resident across the whole grid; only the final state is
    # consumed, so write (and therefore DMA back) exactly once.
    @pl.when(t == pl.num_programs(0) - 1)
    def _():
        hl_ref[...] = h_new


def gru(gi_tbg, wh, bh, h0, *, return_all):
    """gi_tbg: (T, B, 3H) precomputed input gates (time-major).
    Returns all hidden states (T, B, H) if return_all else final state (B, H)."""
    T, B, G = gi_tbg.shape
    H = h0.shape[1]
    in_specs = [
        pl.BlockSpec((1, B, G), lambda t: (t, 0, 0)),  # gi time slice (pipelined)
        pl.BlockSpec((H, G), lambda t: (0, 0)),        # fused Wh, VMEM-resident
        pl.BlockSpec((1, G), lambda t: (0, 0)),        # fused b_h, resident
        pl.BlockSpec((B, H), lambda t: (0, 0)),        # h0, resident
    ]
    if return_all:
        kernel = _gru_all_kernel
        out_spec = pl.BlockSpec((1, B, H), lambda t: (t, 0, 0))
        out_shape = jax.ShapeDtypeStruct((T, B, H), jnp.float32)
    else:
        kernel = _gru_last_kernel
        out_spec = pl.BlockSpec((B, H), lambda t: (0, 0))
        out_shape = jax.ShapeDtypeStruct((B, H), jnp.float32)
    return pl.pallas_call(
        kernel,
        out_shape=out_shape,
        grid_spec=pltpu.PrefetchScalarGridSpec(
            num_scalar_prefetch=0,
            grid=(T,),
            in_specs=in_specs,
            out_specs=out_spec,
            scratch_shapes=[pltpu.VMEM((B, H), jnp.float32)],
        ),
        compiler_params=pltpu.CompilerParams(
            dimension_semantics=("arbitrary",)  # time axis is truly sequential
        ),
    )(gi_tbg, wh, bh, h0)


# -----------------------------------------------------------------------------
# Fused latent head: mu, logvar, z = mu + exp(0.5*logvar)*eps, h0_dec = z@W+b
# -----------------------------------------------------------------------------
def _latent_kernel(h_ref, wmu_ref, bmu_ref, wlv_ref, blv_ref, eps_ref,
                   wl2h_ref, bl2h_ref, mu_ref, lv_ref, h0d_ref):
    h = h_ref[...].astype(jnp.bfloat16)
    mu = jnp.dot(h, wmu_ref[...], preferred_element_type=jnp.float32) + bmu_ref[...]
    lv = jnp.dot(h, wlv_ref[...], preferred_element_type=jnp.float32) + blv_ref[...]
    z = mu + jnp.exp(0.5 * lv) * eps_ref[...]
    h0d = (
        jnp.dot(z.astype(jnp.bfloat16), wl2h_ref[...],
                preferred_element_type=jnp.float32)
        + bl2h_ref[...]
    )
    mu_ref[...] = mu
    lv_ref[...] = lv
    h0d_ref[...] = h0d


def latent_fused(h_last, p, eps):
    B = h_last.shape[0]
    L = p["w_mu"].shape[1]
    H = p["w_l2h"].shape[1]
    return pl.pallas_call(
        _latent_kernel,
        out_shape=(
            jax.ShapeDtypeStruct((B, L), jnp.float32),
            jax.ShapeDtypeStruct((B, L), jnp.float32),
            jax.ShapeDtypeStruct((B, H), jnp.float32),
        ),
    )(h_last, p["w_mu"], p["b_mu"], p["w_lv"], p["b_lv"], eps,
      p["w_l2h"], p["b_l2h"])


# -----------------------------------------------------------------------------
# Parameter construction (deterministic, synthetic).  Matmul weights /
# embeddings in bf16 (MXU-native), biases and state in f32.
# -----------------------------------------------------------------------------
def init_params(key, vocab_size, embedding_dim, hidden_dim, latent_dim):
    ks = jax.random.split(key, 18)
    s = 0.1

    def w(k, shape):
        return (s * jax.random.normal(k, shape)).astype(jnp.bfloat16)

    def b(k, shape):
        return (s * jax.random.normal(k, shape)).astype(jnp.float32)

    H3 = 3 * hidden_dim
    p = {}
    # Encoder (Wi/Wh fused over the r|z|n gates, PyTorch ordering)
    p["enc_emb"] = w(ks[0], (vocab_size, embedding_dim))
    p["enc_wi"] = w(ks[1], (embedding_dim, H3))
    p["enc_wh"] = w(ks[2], (hidden_dim, H3))
    p["enc_bi"] = b(ks[3], (1, H3))
    p["enc_bh"] = b(ks[4], (1, H3))
    p["w_mu"] = w(ks[5], (hidden_dim, latent_dim))
    p["b_mu"] = b(ks[6], (1, latent_dim))
    p["w_lv"] = w(ks[7], (hidden_dim, latent_dim))
    p["b_lv"] = b(ks[8], (1, latent_dim))
    # Decoder
    p["dec_emb"] = w(ks[9], (vocab_size, embedding_dim))
    p["w_l2h"] = w(ks[10], (latent_dim, hidden_dim))
    p["b_l2h"] = b(ks[11], (1, hidden_dim))
    p["dec_wi"] = w(ks[12], (embedding_dim, H3))
    p["dec_wh"] = w(ks[13], (hidden_dim, H3))
    p["dec_bi"] = b(ks[14], (1, H3))
    p["dec_bh"] = b(ks[15], (1, H3))
    # Output projection (hidden -> vocab)
    p["w_out"] = w(ks[16], (hidden_dim, vocab_size))
    p["b_out"] = b(ks[17], (1, vocab_size))
    return p


# -----------------------------------------------------------------------------
# VAE forward (encoder -> reparameterize -> decoder)
# -----------------------------------------------------------------------------
def vae_forward(params, input_sequence, target_sequence, eps):
    B, T = input_sequence.shape
    E = params["enc_emb"].shape[1]
    H = params["enc_wh"].shape[0]
    V = params["w_out"].shape[1]

    # ---------------- Encoder ----------------
    # Time-major gather: transpose the cheap int32 ids, not float embeddings.
    emb_in = jnp.take(params["enc_emb"], input_sequence.T, axis=0)       # (T,B,E)
    # Input-side GRU matmul hoisted out of the recurrence (bias folded in).
    gi_enc = linear(
        emb_in.reshape(T * B, E), params["enc_wi"], params["enc_bi"]
    ).reshape(T, B, 3 * H)
    h0 = jnp.zeros((B, H), jnp.float32)
    h_last = gru(gi_enc, params["enc_wh"], params["enc_bh"], h0,
                 return_all=False)                                       # (B,H)

    # mu / logvar / reparameterize / latent->hidden in one fused kernel.
    mu, logvar, h0_dec = latent_fused(h_last, params, eps)

    # ---------------- Decoder ----------------
    # TODO(synk): word dropout (word_dropout_rate) only applies when training;
    # evaluated here in eval mode so it is the identity.
    emb_tgt = jnp.take(params["dec_emb"], target_sequence.T, axis=0)     # (T,B,E)
    gi_dec = linear(
        emb_tgt.reshape(T * B, E), params["dec_wi"], params["dec_bi"]
    ).reshape(T, B, 3 * H)
    hs_dec = gru(gi_dec, params["dec_wh"], params["dec_bh"], h0_dec,
                 return_all=True)                                        # (T,B,H)

    # Layout glue so logits come out (B, T, V): transpose the (small) hidden
    # states rather than the (large) logits.
    hs_bt = jnp.transpose(hs_dec, (1, 0, 2)).reshape(B * T, H)
    logits = linear(hs_bt, params["w_out"], params["b_out"],
                    tm=256, tn=512).reshape(B, T, V)
    return logits, mu, logvar


# -----------------------------------------------------------------------------
if __name__ == "__main__":
    vocab_size = 32
    embedding_dim = 16
    hidden_dim = 32
    latent_dim = 8
    batch = 2
    seq = 8

    key = jax.random.PRNGKey(0)
    k_par, k_in, k_tgt, k_eps = jax.random.split(key, 4)

    params = init_params(k_par, vocab_size, embedding_dim, hidden_dim, latent_dim)
    input_sequence = jax.random.randint(k_in, (batch, seq), 0, vocab_size, jnp.int32)
    target_sequence = jax.random.randint(k_tgt, (batch, seq), 0, vocab_size, jnp.int32)
    eps = jax.random.normal(k_eps, (batch, latent_dim), jnp.float32)

    logits, mu, logvar = jax.jit(vae_forward)(params, input_sequence,
                                              target_sequence, eps)
    jax.block_until_ready((logits, mu, logvar))

    assert logits.shape == (batch, seq, vocab_size)
    assert mu.shape == (batch, latent_dim)
    assert logvar.shape == (batch, latent_dim)
    assert jnp.all(jnp.isfinite(logits))
    assert jnp.all(jnp.isfinite(mu))
    assert jnp.all(jnp.isfinite(logvar))
    print("KERNEL_OK")
</pallas_src>

<mosaic_0001>
module attributes {stable_mosaic.version = 11 : i64} {
  func.func @_linear_kernel(%arg0: i32, %arg1: i32, %arg2: memref<16x16xbf16, #tpu.memory_space<vmem>>, %arg3: memref<16x96xbf16, #tpu.memory_space<vmem>>, %arg4: memref<1x96xf32, #tpu.memory_space<vmem>>, %arg5: memref<16x96xf32, #tpu.memory_space<vmem>>) attributes {dimension_semantics = [#tpu.dimension_semantics<parallel>, #tpu.dimension_semantics<parallel>], iteration_bounds = array<i64: 1, 1>, scalar_prefetch = 0 : i64, scratch_operands = 0 : i64, tpu.core_type = #tpu.core_type<tc>, window_params = [{transform_indices = @transform_0, window_bounds = array<i64: 16, 16>}, {transform_indices = @transform_1, window_bounds = array<i64: 16, 96>}, {transform_indices = @transform_2, window_bounds = array<i64: 1, 96>}, {transform_indices = @transform_3, window_bounds = array<i64: 16, 96>}]} {
    %c0 = arith.constant 0 : index
    %c0_0 = arith.constant 0 : index
    %0 = vector.load %arg2[%c0, %c0_0] : memref<16x16xbf16, #tpu.memory_space<vmem>>, vector<16x16xbf16>
    %c0_1 = arith.constant 0 : index
    %c0_2 = arith.constant 0 : index
    %1 = vector.load %arg3[%c0_1, %c0_2] : memref<16x96xbf16, #tpu.memory_space<vmem>>, vector<16x96xbf16>
    %cst = arith.constant dense<0.000000e+00> : vector<16x96xf32>
    %2 = tpu.matmul %0, %1, %cst {dimension_numbers = #tpu.dot_dimension_numbers<[1], [0], [0], [1], [0, 0, 1, 1], [], []>} : vector<16x16xbf16>, vector<16x96xbf16>, vector<16x96xf32> -> vector<16x96xf32>
    %c0_3 = arith.constant 0 : index
    %c0_4 = arith.constant 0 : index
    %3 = vector.load %arg4[%c0_3, %c0_4] : memref<1x96xf32, #tpu.memory_space<vmem>>, vector<1x96xf32>
    %4 = vector.broadcast %3 : vector<1x96xf32> to vector<16x96xf32>
    %5 = arith.addf %2, %4 : vector<16x96xf32>
    %c0_5 = arith.constant 0 : index
    %c0_6 = arith.constant 0 : index
    %6 = vector.load %arg5[%c0_5, %c0_6] : memref<16x96xf32, #tpu.memory_space<vmem>>, vector<16x96xf32>
    tpu.vector_store %arg5[%c0_5, %c0_6], %5 {strides = array<i32>} : memref<16x96xf32, #tpu.memory_space<vmem>>, vector<16x96xf32>,
    return
  }
  func.func @transform_0(%arg0: i32, %arg1: i32) -> (i32, i32) {
    %c0_i32 = arith.constant 0 : i32
    %c0_i32_0 = arith.constant 0 : i32
    return %arg0, %c0_i32 : i32, i32
  }
  func.func @transform_1(%arg0: i32, %arg1: i32) -> (i32, i32) {
    %c0_i32 = arith.constant 0 : i32
    %c0_i32_0 = arith.constant 0 : i32
    return %c0_i32, %arg1 : i32, i32
  }
  func.func @transform_2(%arg0: i32, %arg1: i32) -> (i32, i32) {
    %c0_i32 = arith.constant 0 : i32
    %c0_i32_0 = arith.constant 0 : i32
    return %c0_i32, %arg1 : i32, i32
  }
  func.func @transform_3(%arg0: i32, %arg1: i32) -> (i32, i32) {
    %c0_i32 = arith.constant 0 : i32
    return %arg0, %arg1 : i32, i32
  }
}

module attributes {stable_mosaic.version = 11 : i64} {
  func.func @_gru_last_kernel(%arg0: i32, %arg1: memref<1x2x96xf32, #tpu.memory_space<vmem>>, %arg2: memref<32x96xbf16, #tpu.memory_space<vmem>>, %arg3: memref<1x96xf32, #tpu.memory_space<vmem>>, %arg4: memref<2x32xf32, #tpu.memory_space<vmem>>, %arg5: memref<2x32xf32, #tpu.memory_space<vmem>>, %arg6: memref<2x32xf32, #tpu.memory_space<vmem>>) attributes {dimension_semantics = [#tpu.dimension_semantics<arbitrary>], iteration_bounds = array<i64: 8>, scalar_prefetch = 0 : i64, scratch_operands = 1 : i64, tpu.core_type = #tpu.core_type<tc>, window_params = [{transform_indices = @transform_0, window_bounds = array<i64: 1, 2, 96>}, {pipeline_mode = #tpu.pipeline_mode<synchronous>, transform_indices = @transform_1, window_bounds = array<i64: 32, 96>}, {pipeline_mode = #tpu.pipeline_mode<synchronous>, transform_indices = @transform_2, window_bounds = array<i64: 1, 96>}, {pipeline_mode = #tpu.pipeline_mode<synchronous>, transform_indices = @transform_3, window_bounds = array<i64: 2, 32>}, {pipeline_mode = #tpu.pipeline_mode<synchronous>, transform_indices = @transform_4, window_bounds = array<i64: 2, 32>}]} {
    %c0_i32 = arith.constant 0 : i32
    %0 = arith.cmpi eq, %arg0, %c0_i32 : i32
    %1 = arith.extui %0 : i1 to i32
    %c0_i32_0 = arith.constant 0 : i32
    %2 = arith.cmpi ne, %1, %c0_i32_0 : i32
    scf.if %2 {
      %c0_15 = arith.constant 0 : index
      %c0_16 = arith.constant 0 : index
      %42 = vector.load %arg4[%c0_15, %c0_16] : memref<2x32xf32, #tpu.memory_space<vmem>>, vector<2x32xf32>
      %c0_17 = arith.constant 0 : index
      %c0_18 = arith.constant 0 : index
      %43 = vector.load %arg6[%c0_17, %c0_18] : memref<2x32xf32, #tpu.memory_space<vmem>>, vector<2x32xf32>
      tpu.vector_store %arg6[%c0_17, %c0_18], %42 {strides = array<i32>} : memref<2x32xf32, #tpu.memory_space<vmem>>, vector<2x32xf32>,
    } else {
    }
    %c0 = arith.constant 0 : index
    %c0_1 = arith.constant 0 : index
    %c0_2 = arith.constant 0 : index
    %3 = vector.load %arg1[%c0, %c0_1, %c0_2] : memref<1x2x96xf32, #tpu.memory_space<vmem>>, vector<1x2x96xf32>
    %4 = vector.shape_cast %3 : vector<1x2x96xf32> to vector<2x96xf32>
    %c0_3 = arith.constant 0 : index
    %c0_4 = arith.constant 0 : index
    %5 = vector.load %arg6[%c0_3, %c0_4] : memref<2x32xf32, #tpu.memory_space<vmem>>, vector<2x32xf32>
    %6 = arith.truncf %5 : vector<2x32xf32> to vector<2x32xbf16>
    %c0_5 = arith.constant 0 : index
    %c0_6 = arith.constant 0 : index
    %7 = vector.load %arg2[%c0_5, %c0_6] : memref<32x96xbf16, #tpu.memory_space<vmem>>, vector<32x96xbf16>
    %cst = arith.constant dense<0.000000e+00> : vector<2x96xf32>
    %8 = tpu.matmul %6, %7, %cst {dimension_numbers = #tpu.dot_dimension_numbers<[1], [0], [0], [1], [0, 0, 1, 1], [], []>} : vector<2x32xbf16>, vector<32x96xbf16>, vector<2x96xf32> -> vector<2x96xf32>
    %c0_7 = arith.constant 0 : index
    %c0_8 = arith.constant 0 : index
    %9 = vector.load %arg3[%c0_7, %c0_8] : memref<1x96xf32, #tpu.memory_space<vmem>>, vector<1x96xf32>
    %10 = vector.broadcast %9 : vector<1x96xf32> to vector<2x96xf32>
    %11 = arith.addf %8, %10 : vector<2x96xf32>
    %12 = vector.extract_strided_slice %4 {offsets = [0, 0], sizes = [2, 32], strides = [1, 1]} : vector<2x96xf32> to vector<2x32xf32>
    %13 = vector.extract_strided_slice %11 {offsets = [0, 0], sizes = [2, 32], strides = [1, 1]} : vector<2x96xf32> to vector<2x32xf32>
    %14 = arith.addf %12, %13 : vector<2x32xf32>
    %15 = arith.negf %14 : vector<2x32xf32>
    %16 = math.exp %15 : vector<2x32xf32>
    %cst_9 = arith.constant 1.000000e+00 : f32
    %17 = vector.broadcast %cst_9 : f32 to vector<2x32xf32>
    %18 = arith.addf %17, %16 : vector<2x32xf32>
    %19 = arith.divf %17, %18 : vector<2x32xf32>
    %20 = vector.extract_strided_slice %4 {offsets = [0, 32], sizes = [2, 32], strides = [1, 1]} : vector<2x96xf32> to vector<2x32xf32>
    %21 = vector.extract_strided_slice %11 {offsets = [0, 32], sizes = [2, 32], strides = [1, 1]} : vector<2x96xf32> to vector<2x32xf32>
    %22 = arith.addf %20, %21 : vector<2x32xf32>
    %23 = arith.negf %22 : vector<2x32xf32>
    %24 = math.exp %23 : vector<2x32xf32>
    %cst_10 = arith.constant 1.000000e+00 : f32
    %25 = vector.broadcast %cst_10 : f32 to vector<2x32xf32>
    %26 = arith.addf %25, %24 : vector<2x32xf32>
    %27 = arith.divf %25, %26 : vector<2x32xf32>
    %28 = vector.extract_strided_slice %4 {offsets = [0, 64], sizes = [2, 32], strides = [1, 1]} : vector<2x96xf32> to vector<2x32xf32>
    %29 = vector.extract_strided_slice %11 {offsets = [0, 64], sizes = [2, 32], strides = [1, 1]} : vector<2x96xf32> to vector<2x32xf32>
    %30 = arith.mulf %19, %29 : vector<2x32xf32>
    %31 = arith.addf %28, %30 : vector<2x32xf32>
    %32 = math.tanh %31 : vector<2x32xf32>
    %cst_11 = arith.constant 1.000000e+00 : f32
    %33 = vector.broadcast %cst_11 : f32 to vector<2x32xf32>
    %34 = arith.subf %33, %27 : vector<2x32xf32>
    %35 = arith.mulf %34, %32 : vector<2x32xf32>
    %36 = arith.mulf %27, %5 : vector<2x32xf32>
    %37 = arith.addf %35, %36 : vector<2x32xf32>
    %c0_12 = arith.constant 0 : index
    %c0_13 = arith.constant 0 : index
    %38 = vector.load %arg6[%c0_12, %c0_13] : memref<2x32xf32, #tpu.memory_space<vmem>>, vector<2x32xf32>
    tpu.vector_store %arg6[%c0_12, %c0_13], %37 {strides = array<i32>} : memref<2x32xf32, #tpu.memory_space<vmem>>, vector<2x32xf32>,
    %c7_i32 = arith.constant 7 : i32
    %39 = arith.cmpi eq, %arg0, %c7_i32 : i32
    %40 = arith.extui %39 : i1 to i32
    %c0_i32_14 = arith.constant 0 : i32
    %41 = arith.cmpi ne, %40, %c0_i32_14 : i32
    scf.if %41 {
      %c0_15 = arith.constant 0 : index
      %c0_16 = arith.constant 0 : index
      %42 = vector.load %arg5[%c0_15, %c0_16] : memref<2x32xf32, #tpu.memory_space<vmem>>, vector<2x32xf32>
      tpu.vector_store %arg5[%c0_15, %c0_16], %37 {strides = array<i32>} : memref<2x32xf32, #tpu.memory_space<vmem>>, vector<2x32xf32>,
    } else {
    }
    return
  }
  func.func @transform_0(%arg0: i32) -> (i32, i32, i32) {
    %c0_i32 = arith.constant 0 : i32
    %c0_i32_0 = arith.constant 0 : i32
    %c0_i32_1 = arith.constant 0 : i32
    return %arg0, %c0_i32, %c0_i32_0 : i32, i32, i32
  }
  func.func @transform_1(%arg0: i32) -> (i32, i32) {
    %c0_i32 = arith.constant 0 : i32
    %c0_i32_0 = arith.constant 0 : i32
    %c0_i32_1 = arith.constant 0 : i32
    return %c0_i32, %c0_i32_0 : i32, i32
  }
  func.func @transform_2(%arg0: i32) -> (i32, i32) {
    %c0_i32 = arith.constant 0 : i32
    %c0_i32_0 = arith.constant 0 : i32
    %c0_i32_1 = arith.constant 0 : i32
    return %c0_i32, %c0_i32_0 : i32, i32
  }
  func.func @transform_3(%arg0: i32) -> (i32, i32) {
    %c0_i32 = arith.constant 0 : i32
    %c0_i32_0 = arith.constant 0 : i32
    %c0_i32_1 = arith.constant 0 : i32
    return %c0_i32, %c0_i32_0 : i32, i32
  }
  func.func @transform_4(%arg0: i32) -> (i32, i32) {
    %c0_i32 = arith.constant 0 : i32
    %c0_i32_0 = arith.constant 0 : i32
    %c0_i32_1 = arith.constant 0 : i32
    return %c0_i32, %c0_i32_0 : i32, i32
  }
}

module attributes {stable_mosaic.version = 11 : i64} {
  func.func @_latent_kernel(%arg0: memref<2x32xf32, #tpu.memory_space<vmem>>, %arg1: memref<32x8xbf16, #tpu.memory_space<vmem>>, %arg2: memref<1x8xf32, #tpu.memory_space<vmem>>, %arg3: memref<32x8xbf16, #tpu.memory_space<vmem>>, %arg4: memref<1x8xf32, #tpu.memory_space<vmem>>, %arg5: memref<2x8xf32, #tpu.memory_space<vmem>>, %arg6: memref<8x32xbf16, #tpu.memory_space<vmem>>, %arg7: memref<1x32xf32, #tpu.memory_space<vmem>>, %arg8: memref<2x8xf32, #tpu.memory_space<vmem>>, %arg9: memref<2x8xf32, #tpu.memory_space<vmem>>, %arg10: memref<2x32xf32, #tpu.memory_space<vmem>>) attributes {dimension_semantics = [], scalar_prefetch = 0 : i64, scratch_operands = 0 : i64, tpu.core_type = #tpu.core_type<tc>} {
    %c0 = arith.constant 0 : index
    %c0_0 = arith.constant 0 : index
    %0 = vector.load %arg0[%c0, %c0_0] : memref<2x32xf32, #tpu.memory_space<vmem>>, vector<2x32xf32>
    %1 = arith.truncf %0 : vector<2x32xf32> to vector<2x32xbf16>
    %c0_1 = arith.constant 0 : index
    %c0_2 = arith.constant 0 : index
    %2 = vector.load %arg1[%c0_1, %c0_2] : memref<32x8xbf16, #tpu.memory_space<vmem>>, vector<32x8xbf16>
    %cst = arith.constant dense<0.000000e+00> : vector<2x8xf32>
    %3 = tpu.matmul %1, %2, %cst {dimension_numbers = #tpu.dot_dimension_numbers<[1], [0], [0], [1], [0, 0, 1, 1], [], []>} : vector<2x32xbf16>, vector<32x8xbf16>, vector<2x8xf32> -> vector<2x8xf32>
    %c0_3 = arith.constant 0 : index
    %c0_4 = arith.constant 0 : index
    %4 = vector.load %arg2[%c0_3, %c0_4] : memref<1x8xf32, #tpu.memory_space<vmem>>, vector<1x8xf32>
    %5 = vector.broadcast %4 : vector<1x8xf32> to vector<2x8xf32>
    %6 = arith.addf %3, %5 : vector<2x8xf32>
    %c0_5 = arith.constant 0 : index
    %c0_6 = arith.constant 0 : index
    %7 = vector.load %arg3[%c0_5, %c0_6] : memref<32x8xbf16, #tpu.memory_space<vmem>>, vector<32x8xbf16>
    %cst_7 = arith.constant dense<0.000000e+00> : vector<2x8xf32>
    %8 = tpu.matmul %1, %7, %cst_7 {dimension_numbers = #tpu.dot_dimension_numbers<[1], [0], [0], [1], [0, 0, 1, 1], [], []>} : vector<2x32xbf16>, vector<32x8xbf16>, vector<2x8xf32> -> vector<2x8xf32>
    %c0_8 = arith.constant 0 : index
    %c0_9 = arith.constant 0 : index
    %9 = vector.load %arg4[%c0_8, %c0_9] : memref<1x8xf32, #tpu.memory_space<vmem>>, vector<1x8xf32>
    %10 = vector.broadcast %9 : vector<1x8xf32> to vector<2x8xf32>
    %11 = arith.addf %8, %10 : vector<2x8xf32>
    %cst_10 = arith.constant 5.000000e-01 : f32
    %12 = vector.broadcast %cst_10 : f32 to vector<2x8xf32>
    %13 = arith.mulf %12, %11 : vector<2x8xf32>
    %14 = math.exp %13 : vector<2x8xf32>
    %c0_11 = arith.constant 0 : index
    %c0_12 = arith.constant 0 : index
    %15 = vector.load %arg5[%c0_11, %c0_12] : memref<2x8xf32, #tpu.memory_space<vmem>>, vector<2x8xf32>
    %16 = arith.mulf %14, %15 : vector<2x8xf32>
    %17 = arith.addf %6, %16 : vector<2x8xf32>
    %18 = arith.truncf %17 : vector<2x8xf32> to vector<2x8xbf16>
    %c0_13 = arith.constant 0 : index
    %c0_14 = arith.constant 0 : index
    %19 = vector.load %arg6[%c0_13, %c0_14] : memref<8x32xbf16, #tpu.memory_space<vmem>>, vector<8x32xbf16>
    %cst_15 = arith.constant dense<0.000000e+00> : vector<2x32xf32>
    %20 = tpu.matmul %18, %19, %cst_15 {dimension_numbers = #tpu.dot_dimension_numbers<[1], [0], [0], [1], [0, 0, 1, 1], [], []>} : vector<2x8xbf16>, vector<8x32xbf16>, vector<2x32xf32> -> vector<2x32xf32>
    %c0_16 = arith.constant 0 : index
    %c0_17 = arith.constant 0 : index
    %21 = vector.load %arg7[%c0_16, %c0_17] : memref<1x32xf32, #tpu.memory_space<vmem>>, vector<1x32xf32>
    %22 = vector.broadcast %21 : vector<1x32xf32> to vector<2x32xf32>
    %23 = arith.addf %20, %22 : vector<2x32xf32>
    %c0_18 = arith.constant 0 : index
    %c0_19 = arith.constant 0 : index
    %24 = vector.load %arg8[%c0_18, %c0_19] : memref<2x8xf32, #tpu.memory_space<vmem>>, vector<2x8xf32>
    tpu.vector_store %arg8[%c0_18, %c0_19], %6 {strides = array<i32>} : memref<2x8xf32, #tpu.memory_space<vmem>>, vector<2x8xf32>,
    %c0_20 = arith.constant 0 : index
    %c0_21 = arith.constant 0 : index
    %25 = vector.load %arg9[%c0_20, %c0_21] : memref<2x8xf32, #tpu.memory_space<vmem>>, vector<2x8xf32>
    tpu.vector_store %arg9[%c0_20, %c0_21], %11 {strides = array<i32>} : memref<2x8xf32, #tpu.memory_space<vmem>>, vector<2x8xf32>,
    %c0_22 = arith.constant 0 : index
    %c0_23 = arith.constant 0 : index
    %26 = vector.load %arg10[%c0_22, %c0_23] : memref<2x32xf32, #tpu.memory_space<vmem>>, vector<2x32xf32>
    tpu.vector_store %arg10[%c0_22, %c0_23], %23 {strides = array<i32>} : memref<2x32xf32, #tpu.memory_space<vmem>>, vector<2x32xf32>,
    return
  }
}

module attributes {stable_mosaic.version = 11 : i64} {
  func.func @_gru_all_kernel(%arg0: i32, %arg1: memref<1x2x96xf32, #tpu.memory_space<vmem>>, %arg2: memref<32x96xbf16, #tpu.memory_space<vmem>>, %arg3: memref<1x96xf32, #tpu.memory_space<vmem>>, %arg4: memref<2x32xf32, #tpu.memory_space<vmem>>, %arg5: memref<1x2x32xf32, #tpu.memory_space<vmem>>, %arg6: memref<2x32xf32, #tpu.memory_space<vmem>>) attributes {dimension_semantics = [#tpu.dimension_semantics<arbitrary>], iteration_bounds = array<i64: 8>, scalar_prefetch = 0 : i64, scratch_operands = 1 : i64, tpu.core_type = #tpu.core_type<tc>, window_params = [{transform_indices = @transform_0, window_bounds = array<i64: 1, 2, 96>}, {pipeline_mode = #tpu.pipeline_mode<synchronous>, transform_indices = @transform_1, window_bounds = array<i64: 32, 96>}, {pipeline_mode = #tpu.pipeline_mode<synchronous>, transform_indices = @transform_2, window_bounds = array<i64: 1, 96>}, {pipeline_mode = #tpu.pipeline_mode<synchronous>, transform_indices = @transform_3, window_bounds = array<i64: 2, 32>}, {transform_indices = @transform_4, window_bounds = array<i64: 1, 2, 32>}]} {
    %c0_i32 = arith.constant 0 : i32
    %0 = arith.cmpi eq, %arg0, %c0_i32 : i32
    %1 = arith.extui %0 : i1 to i32
    %c0_i32_0 = arith.constant 0 : i32
    %2 = arith.cmpi ne, %1, %c0_i32_0 : i32
    scf.if %2 {
      %c0_17 = arith.constant 0 : index
      %c0_18 = arith.constant 0 : index
      %42 = vector.load %arg4[%c0_17, %c0_18] : memref<2x32xf32, #tpu.memory_space<vmem>>, vector<2x32xf32>
      %c0_19 = arith.constant 0 : index
      %c0_20 = arith.constant 0 : index
      %43 = vector.load %arg6[%c0_19, %c0_20] : memref<2x32xf32, #tpu.memory_space<vmem>>, vector<2x32xf32>
      tpu.vector_store %arg6[%c0_19, %c0_20], %42 {strides = array<i32>} : memref<2x32xf32, #tpu.memory_space<vmem>>, vector<2x32xf32>,
    } else {
    }
    %c0 = arith.constant 0 : index
    %c0_1 = arith.constant 0 : index
    %c0_2 = arith.constant 0 : index
    %3 = vector.load %arg1[%c0, %c0_1, %c0_2] : memref<1x2x96xf32, #tpu.memory_space<vmem>>, vector<1x2x96xf32>
    %4 = vector.shape_cast %3 : vector<1x2x96xf32> to vector<2x96xf32>
    %c0_3 = arith.constant 0 : index
    %c0_4 = arith.constant 0 : index
    %5 = vector.load %arg6[%c0_3, %c0_4] : memref<2x32xf32, #tpu.memory_space<vmem>>, vector<2x32xf32>
    %6 = arith.truncf %5 : vector<2x32xf32> to vector<2x32xbf16>
    %c0_5 = arith.constant 0 : index
    %c0_6 = arith.constant 0 : index
    %7 = vector.load %arg2[%c0_5, %c0_6] : memref<32x96xbf16, #tpu.memory_space<vmem>>, vector<32x96xbf16>
    %cst = arith.constant dense<0.000000e+00> : vector<2x96xf32>
    %8 = tpu.matmul %6, %7, %cst {dimension_numbers = #tpu.dot_dimension_numbers<[1], [0], [0], [1], [0, 0, 1, 1], [], []>} : vector<2x32xbf16>, vector<32x96xbf16>, vector<2x96xf32> -> vector<2x96xf32>
    %c0_7 = arith.constant 0 : index
    %c0_8 = arith.constant 0 : index
    %9 = vector.load %arg3[%c0_7, %c0_8] : memref<1x96xf32, #tpu.memory_space<vmem>>, vector<1x96xf32>
    %10 = vector.broadcast %9 : vector<1x96xf32> to vector<2x96xf32>
    %11 = arith.addf %8, %10 : vector<2x96xf32>
    %12 = vector.extract_strided_slice %4 {offsets = [0, 0], sizes = [2, 32], strides = [1, 1]} : vector<2x96xf32> to vector<2x32xf32>
    %13 = vector.extract_strided_slice %11 {offsets = [0, 0], sizes = [2, 32], strides = [1, 1]} : vector<2x96xf32> to vector<2x32xf32>
    %14 = arith.addf %12, %13 : vector<2x32xf32>
    %15 = arith.negf %14 : vector<2x32xf32>
    %16 = math.exp %15 : vector<2x32xf32>
    %cst_9 = arith.constant 1.000000e+00 : f32
    %17 = vector.broadcast %cst_9 : f32 to vector<2x32xf32>
    %18 = arith.addf %17, %16 : vector<2x32xf32>
    %19 = arith.divf %17, %18 : vector<2x32xf32>
    %20 = vector.extract_strided_slice %4 {offsets = [0, 32], sizes = [2, 32], strides = [1, 1]} : vector<2x96xf32> to vector<2x32xf32>
    %21 = vector.extract_strided_slice %11 {offsets = [0, 32], sizes = [2, 32], strides = [1, 1]} : vector<2x96xf32> to vector<2x32xf32>
    %22 = arith.addf %20, %21 : vector<2x32xf32>
    %23 = arith.negf %22 : vector<2x32xf32>
    %24 = math.exp %23 : vector<2x32xf32>
    %cst_10 = arith.constant 1.000000e+00 : f32
    %25 = vector.broadcast %cst_10 : f32 to vector<2x32xf32>
    %26 = arith.addf %25, %24 : vector<2x32xf32>
    %27 = arith.divf %25, %26 : vector<2x32xf32>
    %28 = vector.extract_strided_slice %4 {offsets = [0, 64], sizes = [2, 32], strides = [1, 1]} : vector<2x96xf32> to vector<2x32xf32>
    %29 = vector.extract_strided_slice %11 {offsets = [0, 64], sizes = [2, 32], strides = [1, 1]} : vector<2x96xf32> to vector<2x32xf32>
    %30 = arith.mulf %19, %29 : vector<2x32xf32>
    %31 = arith.addf %28, %30 : vector<2x32xf32>
    %32 = math.tanh %31 : vector<2x32xf32>
    %cst_11 = arith.constant 1.000000e+00 : f32
    %33 = vector.broadcast %cst_11 : f32 to vector<2x32xf32>
    %34 = arith.subf %33, %27 : vector<2x32xf32>
    %35 = arith.mulf %34, %32 : vector<2x32xf32>
    %36 = arith.mulf %27, %5 : vector<2x32xf32>
    %37 = arith.addf %35, %36 : vector<2x32xf32>
    %c0_12 = arith.constant 0 : index
    %c0_13 = arith.constant 0 : index
    %38 = vector.load %arg6[%c0_12, %c0_13] : memref<2x32xf32, #tpu.memory_space<vmem>>, vector<2x32xf32>
    tpu.vector_store %arg6[%c0_12, %c0_13], %37 {strides = array<i32>} : memref<2x32xf32, #tpu.memory_space<vmem>>, vector<2x32xf32>,
    %c0_14 = arith.constant 0 : index
    %c0_15 = arith.constant 0 : index
    %c0_16 = arith.constant 0 : index
    %39 = vector.load %arg5[%c0_14, %c0_15, %c0_16] : memref<1x2x32xf32, #tpu.memory_space<vmem>>, vector<1x2x32xf32>
    %40 = vector.shape_cast %39 : vector<1x2x32xf32> to vector<2x32xf32>
    %41 = vector.shape_cast %37 : vector<2x32xf32> to vector<1x2x32xf32>
    tpu.vector_store %arg5[%c0_14, %c0_15, %c0_16], %41 {strides = array<i32>} : memref<1x2x32xf32, #tpu.memory_space<vmem>>, vector<1x2x32xf32>,
    return
  }
  func.func @transform_0(%arg0: i32) -> (i32, i32, i32) {
    %c0_i32 = arith.constant 0 : i32
    %c0_i32_0 = arith.constant 0 : i32
    %c0_i32_1 = arith.constant 0 : i32
    return %arg0, %c0_i32, %c0_i32_0 : i32, i32, i32
  }
  func.func @transform_1(%arg0: i32) -> (i32, i32) {
    %c0_i32 = arith.constant 0 : i32
    %c0_i32_0 = arith.constant 0 : i32
    %c0_i32_1 = arith.constant 0 : i32
    return %c0_i32, %c0_i32_0 : i32, i32
  }
  func.func @transform_2(%arg0: i32) -> (i32, i32) {
    %c0_i32 = arith.constant 0 : i32
    %c0_i32_0 = arith.constant 0 : i32
    %c0_i32_1 = arith.constant 0 : i32
    return %c0_i32, %c0_i32_0 : i32, i32
  }
  func.func @transform_3(%arg0: i32) -> (i32, i32) {
    %c0_i32 = arith.constant 0 : i32
    %c0_i32_0 = arith.constant 0 : i32
    %c0_i32_1 = arith.constant 0 : i32
    return %c0_i32, %c0_i32_0 : i32, i32
  }
  func.func @transform_4(%arg0: i32) -> (i32, i32, i32) {
    %c0_i32 = arith.constant 0 : i32
    %c0_i32_0 = arith.constant 0 : i32
    %c0_i32_1 = arith.constant 0 : i32
    return %arg0, %c0_i32, %c0_i32_0 : i32, i32, i32
  }
}

module attributes {stable_mosaic.version = 11 : i64} {
  func.func @_linear_kernel(%arg0: i32, %arg1: i32, %arg2: memref<16x32xf32, #tpu.memory_space<vmem>>, %arg3: memref<32x32xbf16, #tpu.memory_space<vmem>>, %arg4: memref<1x32xf32, #tpu.memory_space<vmem>>, %arg5: memref<16x32xf32, #tpu.memory_space<vmem>>) attributes {dimension_semantics = [#tpu.dimension_semantics<parallel>, #tpu.dimension_semantics<parallel>], iteration_bounds = array<i64: 1, 1>, scalar_prefetch = 0 : i64, scratch_operands = 0 : i64, tpu.core_type = #tpu.core_type<tc>, window_params = [{transform_indices = @transform_0, window_bounds = array<i64: 16, 32>}, {transform_indices = @transform_1, window_bounds = array<i64: 32, 32>}, {transform_indices = @transform_2, window_bounds = array<i64: 1, 32>}, {transform_indices = @transform_3, window_bounds = array<i64: 16, 32>}]} {
    %c0 = arith.constant 0 : index
    %c0_0 = arith.constant 0 : index
    %0 = vector.load %arg2[%c0, %c0_0] : memref<16x32xf32, #tpu.memory_space<vmem>>, vector<16x32xf32>
    %1 = arith.truncf %0 : vector<16x32xf32> to vector<16x32xbf16>
    %c0_1 = arith.constant 0 : index
    %c0_2 = arith.constant 0 : index
    %2 = vector.load %arg3[%c0_1, %c0_2] : memref<32x32xbf16, #tpu.memory_space<vmem>>, vector<32x32xbf16>
    %cst = arith.constant dense<0.000000e+00> : vector<16x32xf32>
    %3 = tpu.matmul %1, %2, %cst {dimension_numbers = #tpu.dot_dimension_numbers<[1], [0], [0], [1], [0, 0, 1, 1], [], []>} : vector<16x32xbf16>, vector<32x32xbf16>, vector<16x32xf32> -> vector<16x32xf32>
    %c0_3 = arith.constant 0 : index
    %c0_4 = arith.constant 0 : index
    %4 = vector.load %arg4[%c0_3, %c0_4] : memref<1x32xf32, #tpu.memory_space<vmem>>, vector<1x32xf32>
    %5 = vector.broadcast %4 : vector<1x32xf32> to vector<16x32xf32>
    %6 = arith.addf %3, %5 : vector<16x32xf32>
    %c0_5 = arith.constant 0 : index
    %c0_6 = arith.constant 0 : index
    %7 = vector.load %arg5[%c0_5, %c0_6] : memref<16x32xf32, #tpu.memory_space<vmem>>, vector<16x32xf32>
    tpu.vector_store %arg5[%c0_5, %c0_6], %6 {strides = array<i32>} : memref<16x32xf32, #tpu.memory_space<vmem>>, vector<16x32xf32>,
    return
  }
  func.func @transform_0(%arg0: i32, %arg1: i32) -> (i32, i32) {
    %c0_i32 = arith.constant 0 : i32
    %c0_i32_0 = arith.constant 0 : i32
    return %arg0, %c0_i32 : i32, i32
  }
  func.func @transform_1(%arg0: i32, %arg1: i32) -> (i32, i32) {
    %c0_i32 = arith.constant 0 : i32
    %c0_i32_0 = arith.constant 0 : i32
    return %c0_i32, %arg1 : i32, i32
  }
  func.func @transform_2(%arg0: i32, %arg1: i32) -> (i32, i32) {
    %c0_i32 = arith.constant 0 : i32
    %c0_i32_0 = arith.constant 0 : i32
    return %c0_i32, %arg1 : i32, i32
  }
  func.func @transform_3(%arg0: i32, %arg1: i32) -> (i32, i32) {
    %c0_i32 = arith.constant 0 : i32
    return %arg0, %arg1 : i32, i32
  }
}

</mosaic_0001>

<bundles_post_ra>
// kernel: vae_forward.10
= control target key start
LH: loop header
LB: loop body
LE: loop exit
PB: predicated region body
PF: predicated region fallthrough
CT: control target
= control target key end

     0   :  { %s446_s15 = smov 0   ;;  %s478_s0 = inlined_call_operand.vmem [shape: f32[8,2,96], index: 0, kind: input, shape index: {}]   ;;  %s479_s1 = inlined_call_operand.vmem [shape: bf16[32,96], index: 1, kind: input, shape index: {}]   ;;  %s480_s2 = inlined_call_operand.vmem [shape: f32[1,96], index: 2, kind: input, shape index: {}]   ;;  %s481_s3 = inlined_call_operand.vmem [shape: f32[2,32], index: 3, kind: input, shape index: {}]   ;;  %s482_s4 = inlined_call_operand.vmem [shape: f32[8,2,32], index: 4, kind: output, shape index: {}]  }
   0x1 LB: > { %s361_s16 = sadd.s32 4294967295, %s414_s15   ;;  %p365_p0 = scmp.ge.s32.totalorder %s414_s15, 1  ;;  %s414_s15 = sphi %s446_s15, %s14_s15  }
   0x2   : > { %p161_p1 = scmp.lt.s32.totalorder %s414_s15, 9 }
   0x4   : > { %p162_p2 = pnand %p365_p0, %p161_p1 }
   0x5   : > { %p185_p3 = scmp.lt.s32.totalorder (!%p162_p2), %s361_s16, 7  ;;  %p368_p4 = scmp.ne.s32.totalorder (!%p162_p2), %s361_s16, 0 }
   0x6   : > { %165 = sbr.rel (%p162_p2) target bundleno = 728 (0x2d8), region = 36 }
   0xd   : > { %s186_s17 = scalar_select %p185_p3, %s361_s16, 7 }
   0xe   : > { %197 = sbr.rel (%p368_p4) target bundleno = 21 (0x15), region = 40  ;;  %v198_v0 = vld [vmem:[%s481_s3] sm:$0x3] (!%p368_p4)  ;;  %vm199_vm0 = vcmask (!%p368_p4), 254976  }
   0xf   : > { %s366_s18 = sshll.u32 %s186_s17, 1  ;;  %200 = vst.msk [vmem:[#allocation2] sm:$0x3] (!%p368_p4), %vm199_vm0, %v198_v0 }
  0x10   : > { %s188_s21 = scalar_lea.vmem %s478_s0, %s366_s18  ;;  %s460_s24 = scalar_lea.vmem %s482_s4, %s366_s18 }
  0x15 PF: > { %v400_v1 = vld [vmem:[%s479_s1] sm:$0xff]   ;;  %v416_v2 = vmov 0.0   ;;  %v401_v3 = vld [vmem:[%s479_s1 + $0x8] sm:$0xff]   ;;  %vm417_vm1 = vmmov 0   ;;  %vm227_vm2 = vcmask 261120   ;;  %s418_s7 = smov 64  }
  0x16   : > { %379 = vmatprep.subr.bf16.mxu0 %v416_v2  ;;  %383 = vmatprep.mubr.msk.bf16.mxu0 %vm417_vm1, %v416_v2  ;;  %v202_v4 = vld [vmem:[#allocation2] sm:$0x3]  ;;  %s419_s8 = smov 96   ;;  %s420_s9 = smov 32   ;;  %vm305_vm3 = vcmask 254976  }
  0x17   : > { %380 = vmatpush3.bf16.msra.mxu0 %v400_v1  ;;  %v203_v5 = vpack.c.bf16 %v202_v4, %v202_v4  ;;  %v369_v6 = vld [vmem:[%s480_s2] ss:$0 sm:$0xff] }
  0x18   : > { %381 = vmatprep.subr.bf16.mxu0 %v416_v2  ;;  %v201_v12 = vld [vmem:[%s188_s21] sm:$0x3] }
  0x1b   : > { %382 = vmatpush3.bf16.msra.mxu0 %v401_v3 }
  0x1e   : > { %384 = vmatmul.mubr.msk.bf16.vlgmr.msra.gmra.mrb[0].mxu0 %vm227_vm2, %v203_v5 }
  0xf1   : > { %v265_v7 = vpop.f32.mrb[0].mxu0 }
  0xf2   : > { %v266_v8 = vadd.f32 %v369_v6, %v265_v7  ;;  %v385_v9 = vpop.f32.mrb[1].mxu0 }
  0xf3   : > { %v268_v10 = vpop.f32.mrb[2].mxu0 }
  0xf4   : > { %279 = vrot.lane.b32.xlu0 %v266_v8, %s418_s7  ;;  %v386_v11 = vpop.f32.mrb[3].mxu0  ;;  %v271_v13 = vadd.f32 %v266_v8, %v201_v12 }
  0xf6   : > { %v373_v14 = vmul.f32 -1.442695, %v271_v13 }
  0xf8   : > { %402 = vpow2.f32 %v373_v14 }
 0x102   : > { %v403_v15 = vpop.eup %402 }
 0x103   : > { %v275_v16 = vadd.f32 1.0, %v403_v15 }
 0x105   : > { %404 = vrcp.f32 %v275_v16 }
 0x10f   : > { %v405_v17 = vpop.eup %404 }
 0x110   : > { %v289_v24 = vsub.f32 1.0, %v405_v17 }
 0x166   : > { %v280_v18 = vpop.permute.xlu0 %279 }
 0x167   : > { %v282_v19 = vmul.f32 %v405_v17, %v280_v18 }
 0x169   : > { %284 = vrot.lane.b32.xlu0 %v282_v19, %s418_s7 }
 0x1db   : > { %v285_v20 = vpop.permute.xlu0 %284 }
 0x1dc   : > { %v287_v21 = vadd.f32 %v285_v20, %v201_v12 }
 0x1de   : > { %406 = vtanh.f32 %v287_v21 }
 0x1e8   : > { %v407_v22 = vpop.eup %406 }
 0x1e9   : > { %291 = vrot.lane.b32.xlu1 %v407_v22, %s419_s8 }
 0x1ed   : > { %296 = vrot.lane.b32.xlu1 %v202_v4, %s420_s9 }
 0x25b   : > { %v292_v23 = vpop.permute.xlu1 %291 }
 0x25c   : > { %v294_v26 = vmul.f32 %v292_v23, %v289_v24 }
 0x25f   : > { %v297_v25 = vpop.permute.xlu1 %296 }
 0x260   : > { %v299_v27 = vmul.f32 %v405_v17, %v297_v25 }
 0x262   : > { %v300_v28 = vadd.f32 %v299_v27, %v294_v26 }
 0x264   : > { %302 = vrot.lane.b32.xlu0 %v300_v28, %s419_s8 }
 0x2d6   : > { %v303_v29 = vpop.permute.xlu0 %302 }
 0x2d7   : > { %306 = vst.msk [vmem:[#allocation2] sm:$0x3] %vm305_vm3, %v303_v29  ;;  %307 = vst.msk [vmem:[%s460_s24] sm:$0x3] %vm305_vm3, %v303_v29 }
 0x2d8 PF: > { %s14_s15 = sadd.s32 1, %s414_s15  }
 0x2d9   : > { %p11_p5 = scmp.ge.s32.totalorder %s14_s15, 10  }
 0x2db   :  { %13 = sbr.rel (!%p11_p5) target bundleno = 1 (0x1), region = 70 }

// kernel: vae_forward.6
= control target key start
LH: loop header
LB: loop body
LE: loop exit
PB: predicated region body
PF: predicated region fallthrough
CT: control target
= control target key end

     0   :  { %v105_v0 = vmov 0.0   ;;  %vm106_vm0 = vmmov 0   ;;  %vm37_vm1 = vcmask 130048   ;;  %vm82_vm2 = vcmask 785408   ;;  %s142_s1 = inlined_call_operand.vmem [shape: bf16[16,96], index: 1, kind: input, shape index: {}]   ;;  %s143_s0 = inlined_call_operand.vmem [shape: bf16[16,16], index: 0, kind: input, shape index: {}]   ;;  %s144_s2 = inlined_call_operand.vmem [shape: f32[1,96], index: 2, kind: input, shape index: {}]   ;;  %s145_s3 = inlined_call_operand.vmem [shape: f32[16,96], index: 3, kind: output, shape index: {}]  }
   0x1   :  { %95 = vmatprep.subr.bf16.mxu0 %v105_v0  ;;  %v103_v1 = vld [vmem:[%s142_s1] sm:$0xff]   ;;  %97 = vmatprep.mubr.msk.bf16.mxu0 %vm106_vm0, %v105_v0 }
   0x2   :  { %v104_v2 = vld [vmem:[%s143_s0] sm:$0xff]   ;;  %96 = vmatpush3.bf16.msra.mxu0 %v103_v1 }
   0x3   :  { %v89_v3 = vld [vmem:[%s144_s2] ss:$0 sm:$0xff] }
   0x5   :  { %98 = vmatmul.mubr.msk.bf16.vlgmr.msra.gmra.mrb[0].mxu0 %vm37_vm1, %v104_v2 }
  0xd8   :  { %v75_v4 = vpop.f32.mrb[0].mxu0 }
  0xd9   :  { %v76_v5 = vadd.f32 %v89_v3, %v75_v4  ;;  %v99_v6 = vpop.f32.mrb[1].mxu0 }
  0xda   :  { %v78_v7 = vpop.f32.mrb[2].mxu0 }
  0xdb   :  { %83 = vst.msk [vmem:[%s145_s3] sm:$0xff] %vm82_vm2, %v76_v5  ;;  %v79_v8 = vadd.f32 %v89_v3, %v78_v7  ;;  %v100_v9 = vpop.f32.mrb[3].mxu0 }
  0xdd   :  { %84 = vst.msk [vmem:[%s145_s3 + $0x8] sm:$0xff] %vm82_vm2, %v79_v8 }

// kernel: vae_forward.7
= control target key start
LH: loop header
LB: loop body
LE: loop exit
PB: predicated region body
PF: predicated region fallthrough
CT: control target
= control target key end

     0   :  { %s411_s15 = smov 0   ;;  %s446_s0 = inlined_call_operand.vmem [shape: f32[8,2,96], index: 0, kind: input, shape index: {}]   ;;  %s447_s1 = inlined_call_operand.vmem [shape: bf16[32,96], index: 1, kind: input, shape index: {}]   ;;  %s448_s2 = inlined_call_operand.vmem [shape: f32[1,96], index: 2, kind: input, shape index: {}]   ;;  %s449_s3 = inlined_call_operand.vmem [shape: f32[2,32], index: 3, kind: input, shape index: {}]   ;;  %s450_s4 = inlined_call_operand.vmem [shape: f32[2,32], index: 4, kind: output, shape index: {}]  }
   0x1 LB: > { %s417_s16 = sadd.s32 4294967295, %s379_s15   ;;  %p330_p0 = scmp.ge.s32.totalorder %s379_s15, 1  ;;  %s379_s15 = sphi %s411_s15, %s14_s15  }
   0x2   : > { %p156_p1 = scmp.lt.s32.totalorder %s379_s15, 9 }
   0x4   : > { %p157_p2 = pnand %p330_p0, %p156_p1 }
   0x5   : > { %p176_p3 = scmp.lt.s32.totalorder (!%p157_p2), %s417_s16, 7  ;;  %p332_p4 = scmp.ne.s32.totalorder (!%p157_p2), %s417_s16, 0 }
   0x6   : > { %160 = sbr.rel (%p157_p2) target bundleno = 728 (0x2d8), region = 36 }
   0xd   : > { %s177_s17 = scalar_select %p176_p3, %s417_s16, 7 }
   0xe   : > { %184 = sbr.rel (%p332_p4) target bundleno = 21 (0x15), region = 40  ;;  %v185_v0 = vld [vmem:[%s449_s3] sm:$0x3] (!%p332_p4)  ;;  %vm186_vm0 = vcmask (!%p332_p4), 254976  }
   0xf   : > { %s331_s18 = sshll.u32 %s177_s17, 1  ;;  %187 = vst.msk [vmem:[#allocation2] sm:$0x3] (!%p332_p4), %vm186_vm0, %v185_v0 }
  0x10   : > { %s179_s21 = scalar_lea.vmem %s446_s0, %s331_s18 }
  0x15 PF: > { %v365_v1 = vld [vmem:[%s447_s1] sm:$0xff]   ;;  %v381_v2 = vmov 0.0   ;;  %v366_v3 = vld [vmem:[%s447_s1 + $0x8] sm:$0xff]   ;;  %vm382_vm1 = vmmov 0   ;;  %vm214_vm2 = vcmask 261120   ;;  %s383_s30 = smov 64  }
  0x16   : > { %344 = vmatprep.subr.bf16.mxu0 %v381_v2  ;;  %348 = vmatprep.mubr.msk.bf16.mxu0 %vm382_vm1, %v381_v2  ;;  %v189_v4 = vld [vmem:[#allocation2] sm:$0x3]  ;;  %s384_s5 = smov 96   ;;  %s385_s6 = smov 32   ;;  %vm292_vm3 = vcmask 254976  }
  0x17   : > { %345 = vmatpush3.bf16.msra.mxu0 %v365_v1  ;;  %v190_v5 = vpack.c.bf16 %v189_v4, %v189_v4  ;;  %v333_v6 = vld [vmem:[%s448_s2] ss:$0 sm:$0xff]  ;;  %p338_p5 = scmp.ne.s32.totalorder %s417_s16, 7 }
  0x18   : > { %346 = vmatprep.subr.bf16.mxu0 %v381_v2  ;;  %v188_v12 = vld [vmem:[%s179_s21] sm:$0x3] }
  0x1b   : > { %347 = vmatpush3.bf16.msra.mxu0 %v366_v3 }
  0x1e   : > { %349 = vmatmul.mubr.msk.bf16.vlgmr.msra.gmra.mrb[0].mxu0 %vm214_vm2, %v190_v5 }
  0xf1   : > { %v252_v7 = vpop.f32.mrb[0].mxu0 }
  0xf2   : > { %v253_v8 = vadd.f32 %v333_v6, %v252_v7  ;;  %v350_v9 = vpop.f32.mrb[1].mxu0 }
  0xf3   : > { %v255_v10 = vpop.f32.mrb[2].mxu0 }
  0xf4   : > { %266 = vrot.lane.b32.xlu0 %v253_v8, %s383_s30  ;;  %v351_v11 = vpop.f32.mrb[3].mxu0  ;;  %v258_v13 = vadd.f32 %v253_v8, %v188_v12 }
  0xf6   : > { %v337_v14 = vmul.f32 -1.442695, %v258_v13 }
  0xf8   : > { %367 = vpow2.f32 %v337_v14 }
 0x102   : > { %v368_v15 = vpop.eup %367 }
 0x103   : > { %v262_v16 = vadd.f32 1.0, %v368_v15 }
 0x105   : > { %369 = vrcp.f32 %v262_v16 }
 0x10f   : > { %v370_v17 = vpop.eup %369 }
 0x110   : > { %v276_v24 = vsub.f32 1.0, %v370_v17 }
 0x166   : > { %v267_v18 = vpop.permute.xlu0 %266 }
 0x167   : > { %v269_v19 = vmul.f32 %v370_v17, %v267_v18 }
 0x169   : > { %271 = vrot.lane.b32.xlu0 %v269_v19, %s383_s30 }
 0x1db   : > { %v272_v20 = vpop.permute.xlu0 %271 }
 0x1dc   : > { %v274_v21 = vadd.f32 %v272_v20, %v188_v12 }
 0x1de   : > { %371 = vtanh.f32 %v274_v21 }
 0x1e8   : > { %v372_v22 = vpop.eup %371 }
 0x1e9   : > { %278 = vrot.lane.b32.xlu1 %v372_v22, %s384_s5 }
 0x1ed   : > { %283 = vrot.lane.b32.xlu1 %v189_v4, %s385_s6 }
 0x25b   : > { %v279_v23 = vpop.permute.xlu1 %278 }
 0x25c   : > { %v281_v26 = vmul.f32 %v279_v23, %v276_v24 }
 0x25f   : > { %v284_v25 = vpop.permute.xlu1 %283 }
 0x260   : > { %v286_v27 = vmul.f32 %v370_v17, %v284_v25 }
 0x262   : > { %v287_v28 = vadd.f32 %v286_v27, %v281_v26 }
 0x264   : > { %289 = vrot.lane.b32.xlu0 %v287_v28, %s384_s5 }
 0x2d1   : > { %297 = sbr.rel (%p338_p5) target bundleno = 728 (0x2d8), region = 44 }
 0x2d6   : > { %v290_v29 = vpop.permute.xlu0 %289 }
 0x2d7   : > { %293 = vst.msk [vmem:[#allocation2] sm:$0x3] %vm292_vm3, %v290_v29  ;;  %298 = vst.msk [vmem:[%s450_s4] sm:$0x3] (!%p338_p5), %vm292_vm3, %v290_v29 }
 0x2d8 PF: > { %s14_s15 = sadd.s32 1, %s379_s15  }
 0x2d9   : > { %p11_p6 = scmp.ge.s32.totalorder %s14_s15, 10  }
 0x2db   :  { %13 = sbr.rel (!%p11_p6) target bundleno = 1 (0x1), region = 70 }

// kernel: vae_forward.8
= control target key start
LH: loop header
LB: loop body
LE: loop exit
PB: predicated region body
PF: predicated region fallthrough
CT: control target
= control target key end

     0   :  { %16 = vsyncpa [#allocation3], 0  ;;  %v365_v1 = vmov 0.0   ;;  %vm366_vm0 = vmmov 0   ;;  %s484_s0 = inlined_call_operand.vmem [shape: f32[2,32], index: 0, kind: input, shape index: {}]   ;;  %s485_s1 = inlined_call_operand.vmem [shape: bf16[32,8], index: 1, kind: input, shape index: {}]   ;;  %s486_s2 = inlined_call_operand.vmem [shape: f32[1,8], index: 2, kind: input, shape index: {}]   ;;  %s487_s3 = inlined_call_operand.vmem [shape: bf16[32,8], index: 3, kind: input, shape index: {}]   ;;  %s488_s4 = inlined_call_operand.vmem [shape: f32[1,8], index: 4, kind: input, shape index: {}]   ;;  %s489_s5 = inlined_call_operand.vmem [shape: f32[2,8], index: 5, kind: input, shape index: {}]   ;;  %s490_s6 = inlined_call_operand.vmem [shape: bf16[8,32], index: 6, kind: input, shape index: {}]   ;;  %s491_s7 = inlined_call_operand.vmem [shape: f32[1,32], index: 7, kind: input, shape index: {}]   ;;  %s492_s8 = inlined_call_operand.hbm [shape: f32[2,8], index: 8, kind: output, shape index: {0}]   ;;  %s493_s9 = inlined_call_operand.hbm [shape: f32[2,8], index: 9, kind: output, shape index: {1}]   ;;  %s494_s10 = inlined_call_operand.vmem [shape: f32[2,32], index: 10, kind: output, shape index: {2}]  }
   0x1   :  { %v311_v0 = vld [vmem:[%s487_s3] sm:$0xff]   ;;  %293 = vmatprep.subr.bf16.mxu1 %v365_v1  ;;  %v312_v2 = vld [vmem:[%s487_s3 + $0x8] sm:$0xff]   ;;  %285 = vmatprep.subr.bf16.mxu0 %v365_v1 }
   0x2   :  { %294 = vmatpush3.bf16.msra.mxu1 %v311_v0  ;;  %297 = vmatprep.mubr.msk.bf16.mxu1 %vm366_vm0, %v365_v1  ;;  %v35_v3 = vld [vmem:[%s484_s0] sm:$0x3]  ;;  %v314_v5 = vld [vmem:[%s485_s1 + $0x8] sm:$0xff]  }
   0x3   :  { %v313_v4 = vld [vmem:[%s485_s1] sm:$0xff]   ;;  %295 = vmatprep.subr.bf16.mxu1 %v365_v1  ;;  %289 = vmatprep.mubr.msk.bf16.mxu0 %vm366_vm0, %v365_v1 }
   0x4   :  { %286 = vmatpush3.bf16.msra.mxu0 %v313_v4 }
   0x5   :  { %17 = vsyncpa [#allocation5], 0  ;;  %v36_v6 = vpack.c.bf16 %v35_v3, %v35_v3  ;;  %287 = vmatprep.subr.bf16.mxu0 %v365_v1  ;;  %vm60_vm1 = vcmask 261120   ;;  %v174_v7 = vld [vmem:[%s490_s6] sm:$0xf]  ;;  %vm186_vm2 = vcmask 1043456  }
   0x6   :  { %296 = vmatpush3.bf16.msra.mxu1 %v312_v2  ;;  %v188_v8 = vsel %vm186_vm2, %v174_v7, 0  ;;  %v271_v9 = vld [vmem:[%s488_s4] ss:$0 sm:$0xff]  ;;  %vm230_vm3 = vcmask 58368   ;;  %vm182_vm4 = vcmask 64512   ;;  %s368_s27 = smov [#allocation4]  }
   0x7   :  { %v267_v11 = vld [vmem:[%s486_s2] ss:$0 sm:$0xff]  ;;  %s367_s2 = smov [#allocation2]   ;;  %s251_s28 = sshll.u32 %s368_s27, 4  ;;  %s252_s28 = int_to_ptr.vmem [resolvable:$true] %s251_s28 }
   0x8   :  { %288 = vmatpush3.bf16.msra.mxu0 %v314_v5  ;;  %v170_v23 = vld [vmem:[%s489_s5] sm:$0x3]  ;;  %s241_s26 = sshll.u32 %s367_s2, 4  ;;  %s242_s26 = int_to_ptr.vmem [resolvable:$true] %s241_s26 }
   0x9   :  { %298 = vmatmul.mubr.msk.bf16.vlgmr.msra.gmra.mrb[0].mxu1 %vm60_vm1, %v36_v6  ;;  %301 = vmatprep.subr.bf16.mxu0 %v365_v1  ;;  %s317_s29 = scalar_lea.vmem %s242_s26, 32  ;;  %p322_p1 = scmp.lt.s32.totalorder %s242_s26, %s242_s26 }
   0xa   :  { %p318_p0 = scmp.ne.s32.totalorder %s242_s26, %s317_s29  ;;  %p323_p2 = scmp.lt.s32.totalorder %s317_s29, %s317_s29 }
   0xb   :  { %290 = vmatmul.mubr.msk.bf16.vlgmr.msra.gmra.mrb[0].mxu0 %vm60_vm1, %v36_v6 }
   0xc   :  { %303 = vmatprep.mubr.msk.bf16.mxu0 %vm366_vm0, %v365_v1  ;;  %302 = vmatpush3.bf16.msra.mxu0 %v188_v8  ;;  %p324_p3 = por %p323_p2, %p322_p1 }
   0xe   :  { %p325_p4 = pnand %p324_p3, %p318_p0 }
  0xdc   :  { %v161_v10 = vpop.f32.mrb[0].mxu1 }
  0xdd   :  { %v162_v12 = vadd.f32 %v271_v9, %v161_v10  ;;  %v299_v13 = vpop.f32.mrb[1].mxu1 }
  0xde   :  { %v164_v14 = vpop.f32.mrb[2].mxu1  ;;  %v98_v15 = vpop.f32.mrb[0].mxu0 }
  0xdf   :  { %v167_v16 = vmul.f32 0.5, %v162_v12  ;;  %v300_v17 = vpop.f32.mrb[3].mxu1  ;;  %v99_v18 = vadd.f32 %v267_v11, %v98_v15  ;;  %v291_v19 = vpop.f32.mrb[1].mxu0  ;;  %232 = vst.msk [vmem:[#allocation4] sm:$0x3] %vm230_vm3, %v162_v12 }
  0xe0   :  { %v101_v20 = vpop.f32.mrb[2].mxu0 }
  0xe1   :  { %v168_v21 = vmul.f32 1.442695, %v167_v16  ;;  %v292_v22 = vpop.f32.mrb[3].mxu0  ;;  %231 = vst.msk [vmem:[#allocation2] sm:$0x3] %vm230_vm3, %v99_v18 }
  0xe3   :  { %315 = vpow2.f32 %v168_v21 }
  0xed   :  { %v316_v24 = vpop.eup %315 }
  0xee   :  { %v171_v25 = vmul.f32 %v316_v24, %v170_v23 }
  0xf0   :  { %v172_v26 = vadd.f32 %v171_v25, %v99_v18 }
  0xf2   :  { %v173_v27 = vpack.c.bf16 %v172_v26, %v172_v26 }
  0xf4   :  { %304 = vmatmul.mubr.msk.bf16.vlgmr.msra.gmra.mrb[4].mxu0 %vm182_vm4, %v173_v27 }
  0xf5   :  { %328 = shalt.err (!%p325_p4)
}
  0xf6   :  { %s329_s11 = scalar_lea.hbm %s492_s8, 32 }
  0xf7   :  { %p330_p5 = scmp.ne.s32.totalorder %s492_s8, %s329_s11  ;;  %p333_p6 = scmp.lt.u32.totalorder %s329_s11, %s492_s8 }
  0xf9   :  { %p335_p7 = pnand %p333_p6, %p330_p5 }
  0xfb   :  { %338 = shalt.err (!%p335_p7)
}
  0xfc   :  { %244 = dma.vmem_to_hbm [thread:$0]  %s242_s26, 32, %s492_s8, [#allocation3]  }
  0xfd   :  { %s339_s18 = scalar_lea.vmem %s252_s28, 32  ;;  %p344_p9 = scmp.lt.s32.totalorder %s252_s28, %s252_s28 }
  0xfe   :  { %p340_p8 = scmp.ne.s32.totalorder %s252_s28, %s339_s18  ;;  %p345_p10 = scmp.lt.s32.totalorder %s339_s18, %s339_s18 }
 0x100   :  { %p346_p11 = por %p345_p10, %p344_p9 }
 0x102   :  { %p347_p12 = pnand %p346_p11, %p340_p8 }
 0x104   :  { %350 = shalt.err (!%p347_p12)
}
 0x105   :  { %s351_s21 = scalar_lea.hbm %s493_s9, 32 }
 0x106   :  { %p352_p13 = scmp.ne.s32.totalorder %s493_s9, %s351_s21  ;;  %p355_p0 = scmp.lt.u32.totalorder %s351_s21, %s493_s9 }
 0x108   :  { %p357_p1 = pnand %p355_p0, %p352_p13 }
 0x10a   :  { %360 = shalt.err (!%p357_p1)
}
 0x10b   :  { %254 = dma.vmem_to_hbm [thread:$0]  %s252_s28, 32, %s493_s9, [#allocation5]   ;;  %v275_v28 = vld [vmem:[%s491_s7] ss:$0 sm:$0xff]  ;;  %vm233_vm5 = vcmask 254976  }
 0x1c7   :  { %v224_v29 = vpop.f32.mrb[4].mxu0 }
 0x1c8   :  { %v225_v30 = vadd.f32 %v275_v28, %v224_v29  ;;  %v305_v31 = vpop.f32.mrb[5].mxu0 }
 0x1c9   :  { %v227_v32 = vpop.f32.mrb[6].mxu0 }
 0x1ca   :  { %234 = vst.msk [vmem:[%s494_s10] sm:$0x3] %vm233_vm5, %v225_v30  ;;  %v306_v33 = vpop.f32.mrb[7].mxu0 }
 0x1cb   :  { %361 = dma.done.wait [#allocation3], 32  }
 0x1cc   :  { %362 = vsyncadd [#allocation3], 4294967264 }
 0x1cd   :  { %363 = dma.done.wait [#allocation5], 32  }
 0x1ce   :  { %364 = vsyncadd [#allocation5], 4294967264 }
 0x1cf   :  { %265 = vsyncpa [#allocation3], 1 }
 0x1d0   :  { %266 = vsyncpa [#allocation5], 1 }

// kernel: vae_forward.11
= control target key start
LH: loop header
LB: loop body
LE: loop exit
PB: predicated region body
PF: predicated region fallthrough
CT: control target
= control target key end

     0   :  { %v151_v1 = vmov 0.0   ;;  %vm152_vm0 = vmmov 0   ;;  %s203_s0 = inlined_call_operand.vmem [shape: f32[16,32], index: 0, kind: input, shape index: {}]   ;;  %s204_s1 = inlined_call_operand.vmem [shape: bf16[32,32], index: 1, kind: input, shape index: {}]   ;;  %s205_s2 = inlined_call_operand.vmem [shape: f32[1,32], index: 2, kind: input, shape index: {}]   ;;  %s206_s3 = inlined_call_operand.hbm [shape: f32[16,32], index: 3, kind: output, shape index: {}]  }
   0x1   :  { %v125_v0 = vld [vmem:[%s204_s1] sm:$0xff]   ;;  %112 = vmatprep.subr.bf16.mxu0 %v151_v1  ;;  %v126_v2 = vld [vmem:[%s204_s1 + $0x8] sm:$0xff]   ;;  %116 = vmatprep.mubr.msk.bf16.mxu0 %vm152_vm0, %v151_v1 }
   0x2   :  { %113 = vmatpush3.bf16.msra.mxu0 %v125_v0  ;;  %v16_v3 = vld [vmem:[%s203_s0] sm:$0xff]  ;;  %v17_v4 = vld [vmem:[%s203_s0 + $0x8] sm:$0xff] }
   0x3   :  { %114 = vmatprep.subr.bf16.mxu0 %v151_v1 }
   0x4   :  { %8 = vsyncpa [#allocation3], 0  ;;  %v18_v5 = vpack.c.bf16 %v17_v4, %v16_v3  ;;  %vm42_vm1 = vcmask 261120   ;;  %v105_v6 = vld [vmem:[%s205_s2] ss:$0 sm:$0xff]  ;;  %s153_s1 = smov [#allocation2]  }
   0x5   :  { %s94_s22 = sshll.u32 %s153_s1, 4  ;;  %s95_s22 = int_to_ptr.vmem [resolvable:$true] %s94_s22 }
   0x6   :  { %115 = vmatpush3.bf16.msra.mxu0 %v126_v2  ;;  %s127_s0 = scalar_lea.vmem %s95_s22, 256  ;;  %p132_p1 = scmp.lt.s32.totalorder %s95_s22, %s95_s22 }
   0x7   :  { %p128_p0 = scmp.ne.s32.totalorder %s95_s22, %s127_s0  ;;  %p133_p2 = scmp.lt.s32.totalorder %s127_s0, %s127_s0 }
   0x9   :  { %117 = vmatmul.mubr.msk.bf16.vlgmr.msra.gmra.mrb[0].mxu0 %vm42_vm1, %v18_v5  ;;  %p134_p3 = por %p133_p2, %p132_p1 }
   0xb   :  { %p135_p4 = pnand %p134_p3, %p128_p0 }
  0xdc   :  { %v80_v7 = vpop.f32.mrb[0].mxu0 }
  0xdd   :  { %v81_v8 = vadd.f32 %v105_v6, %v80_v7  ;;  %v118_v9 = vpop.f32.mrb[1].mxu0 }
  0xde   :  { %v83_v10 = vpop.f32.mrb[2].mxu0 }
  0xdf   :  { %87 = vst.msk [vmem:[#allocation2] sm:$0xff] %vm42_vm1, %v81_v8  ;;  %v84_v11 = vadd.f32 %v105_v6, %v83_v10  ;;  %v119_v12 = vpop.f32.mrb[3].mxu0 }
  0xe1   :  { %88 = vst.msk [vmem:[#allocation2 + $0x8] sm:$0xff] %vm42_vm1, %v84_v11 }
  0xe2   :  { %138 = shalt.err (!%p135_p4)
}
  0xe3   :  { %s139_s24 = scalar_lea.hbm %s206_s3, 256 }
  0xe4   :  { %p140_p5 = scmp.ne.s32.totalorder %s206_s3, %s139_s24  ;;  %p143_p6 = scmp.lt.u32.totalorder %s139_s24, %s206_s3 }
  0xe6   :  { %p145_p7 = pnand %p143_p6, %p140_p5 }
  0xe8   :  { %148 = shalt.err (!%p145_p7)
}
  0xe9   :  { %s154_s29 = smov 128   ;;  %s155_s30 = smov 8  }
  0xea   :  { %100 = dma.vmem_to_hbm [thread:$0]  %s95_s22, 256, %s206_s3, [#allocation3], %s154_s29, %s154_s29, %s155_s30  }
  0xeb   :  { %149 = dma.done.wait [#allocation3], 256  }
  0xec   :  { %150 = vsyncadd [#allocation3], 4294967040 }
  0xed   :  { %104 = vsyncpa [#allocation3], 1 }

</bundles_post_ra>
